<compile_context>
chip_gen: v7x
topology: tpu7x:2x2x1
jax: 0.10.0
libtpu: 0.0.40
codegen_flags: <defaults>
</compile_context>

<pallas_src>
import jax
import jax.numpy as jnp
from jax.experimental import pallas as pl
from jax.experimental.pallas import tpu as pltpu

_LANE = 128                      # full vreg lane width -> unmasked stores
_SUBLANE = 8                     # f32 sublane granule
_MAX_BLOCK_ROWS = 8192           # (8192, 128) f32 = 4 MiB per operand
_MIN_SPLIT_ROWS = 256            # below this: one full-extent block is cheapest
_TARGET_BLOCKS = 8               # aim for >= ~8 grid steps -> pipelining + 2 TCs
_VMEM_LIMIT_BYTES = 48 * 1024 * 1024   # > v5e 16 MiB default, < v7x 64 MiB phys


def _add_relu_kernel(a_ref, b_ref, o_ref):
    # Fused add + relu on the VPU.
    s = a_ref[...] + b_ref[...]
    o_ref[...] = jnp.maximum(s, jnp.zeros_like(s))


def _round_up(x: int, m: int) -> int:
    return ((x + m - 1) // m) * m


def _add_relu_2d(a2: jax.Array, b2: jax.Array) -> jax.Array:
    """add+relu on a lane-dense (rows, 128) view."""
    rows = a2.shape[0]
    dtype = a2.dtype

    if rows <= _MIN_SPLIT_ROWS:
        # Tiny tensor: a single block equal to the full array (no (8,128)
        # divisibility requirement in that case); splitting would only add
        # ~0.35 us fixed cost per extra grid step.
        block_rows = rows
    else:
        # Split into at least ~_TARGET_BLOCKS blocks (sublane-aligned) so the
        # BlockSpec pipeline overlaps DMA and compute and the parallel grid
        # axis shards across both TensorCores on v7x.  Cap the block at
        # 4 MiB/operand so double-buffering 3 operands stays well inside the
        # 48 MiB scoped-VMEM budget on every generation.
        block_rows = max(_SUBLANE,
                         _round_up(pl.cdiv(rows, _TARGET_BLOCKS), _SUBLANE))
        block_rows = min(block_rows, _MAX_BLOCK_ROWS)

    grid = (pl.cdiv(rows, block_rows),)

    # Partial trailing block (rows % block_rows != 0) is fine: the op is
    # elementwise and Pallas masks out-of-bounds writes, so boundary garbage
    # never escapes.
    itemsize = jnp.dtype(dtype).itemsize
    cost = pl.CostEstimate(
        flops=2 * rows * _LANE,                       # add + max
        transcendentals=0,
        bytes_accessed=3 * rows * _LANE * itemsize,   # 2 reads + 1 write
    )

    return pl.pallas_call(
        _add_relu_kernel,
        out_shape=jax.ShapeDtypeStruct((rows, _LANE), dtype),
        grid=grid,
        in_specs=[
            pl.BlockSpec((block_rows, _LANE), lambda i: (i, 0)),
            pl.BlockSpec((block_rows, _LANE), lambda i: (i, 0)),
        ],
        out_specs=pl.BlockSpec((block_rows, _LANE), lambda i: (i, 0)),
        compiler_params=pltpu.CompilerParams(
            # No reduction/accumulator: the row axis is trivially parallel.
            dimension_semantics=("parallel",),
            vmem_limit_bytes=_VMEM_LIMIT_BYTES,
        ),
        cost_estimate=cost,
    )(a2, b2)


def add_relu(x86: jax.Array, x88: jax.Array) -> jax.Array:
    assert x86.shape == x88.shape and x86.dtype == x88.dtype
    orig_shape = x86.shape
    total = x86.size

    if total % _LANE == 0:
        # Common case (all conv feature maps here): a free reshape to the
        # lane-dense 2-D view, no padding, no extra HBM traffic.
        out2 = _add_relu_2d(x86.reshape(-1, _LANE), x88.reshape(-1, _LANE))
        return out2.reshape(orig_shape)

    # Ragged case: run the kernel on the lane-aligned bulk and compute the
    # final <128 elements with a tiny XLA op.  This avoids jnp.pad, which
    # would materialize a full extra copy of each input in HBM (doubling
    # traffic for a purely mem-bound op).
    a_flat = x86.reshape(-1)
    b_flat = x88.reshape(-1)
    bulk = (total // _LANE) * _LANE
    tail = jnp.maximum(a_flat[bulk:] + b_flat[bulk:], 0).astype(x86.dtype)
    if bulk == 0:
        out_flat = tail
    else:
        out_bulk = _add_relu_2d(
            a_flat[:bulk].reshape(-1, _LANE),
            b_flat[:bulk].reshape(-1, _LANE),
        ).reshape(-1)
        out_flat = jnp.concatenate([out_bulk, tail])
    return out_flat.reshape(orig_shape)


def _check(shape, key):
    k1, k2 = jax.random.split(key)
    a = jax.random.normal(k1, shape, dtype=jnp.float32)
    b = jax.random.normal(k2, shape, dtype=jnp.float32)
    out = add_relu(a, b)
    jax.block_until_ready(out)
    ref = jnp.maximum(a + b, 0.0)
    assert out.shape == ref.shape and out.dtype == ref.dtype
    assert jnp.allclose(out, ref, atol=1e-6, rtol=1e-6)


if __name__ == "__main__":
    key = jax.random.PRNGKey(0)
    k_small, k_module, k_big, k_ragged = jax.random.split(key, 4)

    # Small shape consistent with the module's NCHW conv-feature inputs.
    _check((2, 4, 16, 16), k_small)        # 16 rows -> single-block path
    # Actual module shape from the spec.
    _check((1, 1024, 14, 14), k_module)    # 1568 rows -> 8-block pipelined path
    # Larger feature map: multi-block pipelined path with bigger tiles.
    _check((2, 64, 128, 128), k_big)       # 16384 rows -> 8 blocks of 2048 rows
    # Non-multiple-of-128 size: lane-aligned bulk kernel + tiny XLA tail.
    _check((2, 3, 11, 11), k_ragged)       # 726 elems -> 640 bulk + 86 tail

    print("KERNEL_OK")
</pallas_src>

<mosaic_0001>
module attributes {stable_mosaic.version = 11 : i64} {
  func.func @_add_relu_kernel(%arg0: i32, %arg1: memref<16x128xf32, #tpu.memory_space<vmem>>, %arg2: memref<16x128xf32, #tpu.memory_space<vmem>>, %arg3: memref<16x128xf32, #tpu.memory_space<vmem>>) attributes {dimension_semantics = [#tpu.dimension_semantics<parallel>], iteration_bounds = array<i64: 1>, scalar_prefetch = 0 : i64, scratch_operands = 0 : i64, tpu.core_type = #tpu.core_type<tc>, window_params = [{transform_indices = @transform_0, window_bounds = array<i64: 16, 128>}, {transform_indices = @transform_1, window_bounds = array<i64: 16, 128>}, {transform_indices = @transform_2, window_bounds = array<i64: 16, 128>}]} {
    %c0 = arith.constant 0 : index
    %c0_0 = arith.constant 0 : index
    %0 = vector.load %arg1[%c0, %c0_0] : memref<16x128xf32, #tpu.memory_space<vmem>>, vector<16x128xf32>
    %c0_1 = arith.constant 0 : index
    %c0_2 = arith.constant 0 : index
    %1 = vector.load %arg2[%c0_1, %c0_2] : memref<16x128xf32, #tpu.memory_space<vmem>>, vector<16x128xf32>
    %2 = arith.addf %0, %1 : vector<16x128xf32>
    %cst = arith.constant 0.000000e+00 : f32
    %3 = vector.broadcast %cst : f32 to vector<16x128xf32>
    %4 = arith.maximumf %2, %3 : vector<16x128xf32>
    %c0_3 = arith.constant 0 : index
    %c0_4 = arith.constant 0 : index
    %5 = vector.load %arg3[%c0_3, %c0_4] : memref<16x128xf32, #tpu.memory_space<vmem>>, vector<16x128xf32>
    tpu.vector_store %arg3[%c0_3, %c0_4], %4 {strides = array<i32>} : memref<16x128xf32, #tpu.memory_space<vmem>>, vector<16x128xf32>,
    return
  }
  func.func @transform_0(%arg0: i32) -> (i32, i32) {
    %c0_i32 = arith.constant 0 : i32
    %c0_i32_0 = arith.constant 0 : i32
    return %arg0, %c0_i32 : i32, i32
  }
  func.func @transform_1(%arg0: i32) -> (i32, i32) {
    %c0_i32 = arith.constant 0 : i32
    %c0_i32_0 = arith.constant 0 : i32
    return %arg0, %c0_i32 : i32, i32
  }
  func.func @transform_2(%arg0: i32) -> (i32, i32) {
    %c0_i32 = arith.constant 0 : i32
    %c0_i32_0 = arith.constant 0 : i32
    return %arg0, %c0_i32 : i32, i32
  }
}

</mosaic_0001>

<bundles_post_ra>
// kernel: tpu_custom_call.1
= control target key start
LH: loop header
LB: loop body
LE: loop exit
PB: predicated region body
PF: predicated region fallthrough
CT: control target
= control target key end

     0   :  { %7 = vsyncpa [#allocation3], 0  ;;  %s210_s0 = inlined_call_operand.hbm [shape: f32[16,128], index: 0, kind: input, shape index: {}]   ;;  %s211_s1 = inlined_call_operand.hbm [shape: f32[16,128], index: 1, kind: input, shape index: {}]   ;;  %s212_s2 = inlined_call_operand.hbm [shape: f32[16,128], index: 2, kind: output, shape index: {}]  }
   0x1   :  { %8 = vsyncpa [#allocation6], 0 }
   0x2   :  { %9 = vsyncpa [#allocation4], 0  ;;  %s145_s9 = smov [#allocation2]   ;;  %s73_s13 = scalar_lea.hbm %s210_s0, 256 }
   0x3   :  { %s15_s10 = sshll.u32 %s145_s9, 4  ;;  %p74_p0 = scmp.ne.s32.totalorder %s210_s0, %s73_s13  ;;  %s16_s10 = int_to_ptr.vmem [resolvable:$true] %s15_s10 }
   0x4   :  { %p77_p1 = scmp.lt.u32.totalorder %s73_s13, %s210_s0 }
   0x6   :  { %p79_p2 = pnand %p77_p1, %p74_p0 }
   0x8   :  { %82 = shalt.err (!%p79_p2)
}
   0x9   :  { %s83_s18 = scalar_lea.vmem %s16_s10, 256  ;;  %p88_p4 = scmp.lt.s32.totalorder %s16_s10, %s16_s10 }
   0xa   :  { %p84_p3 = scmp.ne.s32.totalorder %s16_s10, %s83_s18  ;;  %p89_p5 = scmp.lt.s32.totalorder %s83_s18, %s83_s18 }
   0xc   :  { %p90_p6 = por %p89_p5, %p88_p4 }
   0xe   :  { %p91_p7 = pnand %p90_p6, %p84_p3 }
  0x10   :  { %94 = shalt.err (!%p91_p7)
}
  0x11   :  { %s146_s19 = smov 128   ;;  %s147_s20 = smov 8  }
  0x12   :  { %21 = dma.hbm_to_vmem [thread:$0]  %s210_s0, 256, %s16_s10, [#allocation3], %s146_s19, %s146_s19, %s147_s20  }
  0x13   :  { %s148_s23 = smov [#allocation5]   ;;  %s95_s27 = scalar_lea.hbm %s211_s1, 256 }
  0x14   :  { %s27_s24 = sshll.u32 %s148_s23, 4  ;;  %p96_p8 = scmp.ne.s32.totalorder %s211_s1, %s95_s27  ;;  %s28_s24 = int_to_ptr.vmem [resolvable:$true] %s27_s24 }
  0x15   :  { %p99_p9 = scmp.lt.u32.totalorder %s95_s27, %s211_s1 }
  0x17   :  { %p101_p10 = pnand %p99_p9, %p96_p8 }
  0x19   :  { %104 = shalt.err (!%p101_p10)
}
  0x1a   :  { %s105_s4 = scalar_lea.vmem %s28_s24, 256  ;;  %p110_p12 = scmp.lt.s32.totalorder %s28_s24, %s28_s24 }
  0x1b   :  { %p106_p11 = scmp.ne.s32.totalorder %s28_s24, %s105_s4  ;;  %p111_p13 = scmp.lt.s32.totalorder %s105_s4, %s105_s4 }
  0x1d   :  { %p112_p0 = por %p111_p13, %p110_p12 }
  0x1f   :  { %p113_p1 = pnand %p112_p0, %p106_p11 }
  0x21   :  { %116 = shalt.err (!%p113_p1)
}
  0x22   :  { %33 = dma.hbm_to_vmem [thread:$0]  %s211_s1, 256, %s28_s24, [#allocation6], %s146_s19, %s146_s19, %s147_s20  }
  0x23   :  { %139 = dma.done.wait [#allocation3], 256  }
  0x24   :  { %140 = vsyncadd [#allocation3], 4294967040 }
  0x25   :  { %141 = dma.done.wait [#allocation6], 256  }
  0x26   :  { %142 = vsyncadd [#allocation6], 4294967040  ;;  %v40_v0 = vld [vmem:[#allocation2] sm:$0xff]  ;;  %v42_v1 = vld [vmem:[#allocation5] sm:$0xff]  ;;  %s149_s6 = smov [#allocation7]  }
  0x27   :  { %v41_v2 = vld [vmem:[#allocation2 + $0x8] sm:$0xff]  ;;  %v44_v3 = vadd.f32 %v42_v1, %v40_v0  ;;  %v43_v4 = vld [vmem:[#allocation5 + $0x8] sm:$0xff]  ;;  %s55_s7 = sshll.u32 %s149_s6, 4  ;;  %s56_s7 = int_to_ptr.vmem [resolvable:$true] %s55_s7 }
  0x28   :  { %v45_v5 = vadd.f32 %v43_v4, %v41_v2  ;;  %s117_s8 = scalar_lea.vmem %s56_s7, 256  ;;  %p122_p3 = scmp.lt.s32.totalorder %s56_s7, %s56_s7 }
  0x29   :  { %v46_v6 = vmax.f32 %v44_v3, 0.0  ;;  %p118_p2 = scmp.ne.s32.totalorder %s56_s7, %s117_s8  ;;  %p123_p4 = scmp.lt.s32.totalorder %s117_s8, %s117_s8 }
  0x2a   :  { %v47_v7 = vmax.f32 %v45_v5, 0.0 }
  0x2b   :  { %48 = vst [vmem:[#allocation7] sm:$0xff] %v46_v6  ;;  %p124_p5 = por %p123_p4, %p122_p3 }
  0x2c   :  { %49 = vst [vmem:[#allocation7 + $0x8] sm:$0xff] %v47_v7 }
  0x2d   :  { %p125_p6 = pnand %p124_p5, %p118_p2 }
  0x2f   :  { %128 = shalt.err (!%p125_p6)
}
  0x30   :  { %s129_s10 = scalar_lea.hbm %s212_s2, 256 }
  0x31   :  { %p130_p7 = scmp.ne.s32.totalorder %s212_s2, %s129_s10  ;;  %p133_p8 = scmp.lt.u32.totalorder %s129_s10, %s212_s2 }
  0x33   :  { %p135_p9 = pnand %p133_p8, %p130_p7 }
  0x35   :  { %138 = shalt.err (!%p135_p9)
}
  0x36   :  { %61 = dma.vmem_to_hbm [thread:$0]  %s56_s7, 256, %s212_s2, [#allocation4], %s146_s19, %s146_s19, %s147_s20  }
  0x37   :  { %143 = dma.done.wait [#allocation4], 256  }
  0x38   :  { %144 = vsyncadd [#allocation4], 4294967040 }
  0x39   :  { %65 = vsyncpa [#allocation3], 1 }
  0x3a   :  { %66 = vsyncpa [#allocation6], 1 }
  0x3b   :  { %67 = vsyncpa [#allocation4], 1 }

</bundles_post_ra>
